<compile_context>
chip_gen: v6e
topology: v6e:2x2x1
jax: 0.10.0
libtpu: 0.0.40
codegen_flags: <defaults>
</compile_context>

<pallas_src>
import jax
import jax.numpy as jnp
from jax.experimental import pallas as pl
from jax.experimental.pallas import tpu as pltpu

B = 2          # batch
L = 10         # Conv1d input length  -> conv output length L-1 = 9
C = 16         # conv output channels
T = L - 1      # 9
K = C * T      # 144 (flattened conv features, channel-major: k = c*T + t)
H = 64         # fc1 hidden
O = 2          # fc2 output


def semaforo_kernel(x_ref, a_ref, cb_ref, w1_ref, b1_ref, w2_ref, b2_ref, out_ref):
    # x_ref : (B, L)    VMEM   input (channel dim already squeezed)
    # a_ref : (L, K)    VMEM   fused conv+flatten matrix
    # cb_ref: (1, K)    VMEM   conv bias repeated T times per channel (channel-major)
    # w1_ref: (K, H)    VMEM   fc1 weight (transposed; K order == PyTorch flatten order)
    # b1_ref: (1, H)    VMEM
    # w2_ref: (H, O)    VMEM   fc2 weight (transposed)
    # b2_ref: (1, O)    VMEM
    # out_ref:(B, O)    VMEM
    x = x_ref[...]                                                     # (B, L)

    # Conv1d(k=2) + Flatten as one matmul, then ReLU.
    flat = jnp.dot(x, a_ref[...],
                   preferred_element_type=jnp.float32) + cb_ref[...]   # (B, 144)
    flat = jnp.maximum(flat, 0.0)

    # fc1 + ReLU (single K=144 matmul).
    hid = jnp.dot(flat, w1_ref[...],
                  preferred_element_type=jnp.float32) + b1_ref[...]    # (B, 64)
    hid = jnp.maximum(hid, 0.0)

    # fc2.
    out = jnp.dot(hid, w2_ref[...],
                  preferred_element_type=jnp.float32) + b2_ref[...]    # (B, 2)
    out_ref[...] = out.astype(out_ref.dtype)


def _build_conv_flatten_matrix(conv_w):
    """Fold Conv1d(1->C, k=2) + channel-major Flatten into a single (L, C*T) matrix A:
       flat[b, c*T + t] = x[b, t] * w[c,0] + x[b, t+1] * w[c,1]  ==  (x @ A)[b, c*T + t]."""
    w0 = conv_w[:, 0, 0]                                   # (C,)
    w1 = conv_w[:, 0, 1]                                   # (C,)
    t_idx = jnp.arange(T)                                  # (T,)
    c_idx = jnp.arange(C)                                  # (C,)
    k_idx = c_idx[:, None] * T + t_idx[None, :]            # (C, T) flatten indices
    A = jnp.zeros((L, K), jnp.float32)
    A = A.at[jnp.broadcast_to(t_idx[None, :], (C, T)), k_idx].add(w0[:, None])
    A = A.at[jnp.broadcast_to(t_idx[None, :] + 1, (C, T)), k_idx].add(w1[:, None])
    return A


def semaforo_forward(x_ncl, params):
    """x_ncl: (B, 1, L) float32, PyTorch NCL layout."""
    conv_w, conv_b, fc1_w, fc1_b, fc2_w, fc2_b = params

    # Glue / parameter re-layout (plain JAX, outside the kernel):
    x2d = x_ncl[:, 0, :]                                   # (B, L)
    A = _build_conv_flatten_matrix(conv_w)                 # (L, K)
    cb_flat = jnp.repeat(conv_b, T).reshape(1, K)          # (1, K) channel-major
    w1t = fc1_w.T                                          # (K, H) — column order is already c*T+t
    b1r = fc1_b.reshape(1, H)
    w2t = fc2_w.T                                          # (H, O)
    b2r = fc2_b.reshape(1, O)

    vmem = pl.BlockSpec(memory_space=pltpu.MemorySpace.VMEM)
    return pl.pallas_call(
        semaforo_kernel,
        out_shape=jax.ShapeDtypeStruct((B, O), jnp.float32),
        in_specs=[vmem, vmem, vmem, vmem, vmem, vmem, vmem],
        out_specs=vmem,
    )(x2d, A, cb_flat, w1t, b1r, w2t, b2r)


def reference_forward(x_ncl, params):
    """Pure-JAX reference matching the PyTorch module."""
    conv_w, conv_b, fc1_w, fc1_b, fc2_w, fc2_b = params
    x = x_ncl[:, 0, :]                                     # (B, L)
    y0, y1 = x[:, :T], x[:, 1:T + 1]
    # conv[b, c, t]
    conv = (y0[:, None, :] * conv_w[None, :, 0, 0, None]
            + y1[:, None, :] * conv_w[None, :, 0, 1, None]
            + conv_b[None, :, None])
    conv = jnp.maximum(conv, 0.0)
    flat = conv.reshape(x.shape[0], K)                     # channel-major flatten
    h = jnp.maximum(flat @ fc1_w.T + fc1_b, 0.0)
    return h @ fc2_w.T + fc2_b


def init_params(key):
    ks = jax.random.split(key, 6)
    conv_w = jax.random.normal(ks[0], (C, 1, 2), jnp.float32) * 0.5
    conv_b = jax.random.normal(ks[1], (C,), jnp.float32) * 0.1
    fc1_w = jax.random.normal(ks[2], (H, K), jnp.float32) * 0.1
    fc1_b = jax.random.normal(ks[3], (H,), jnp.float32) * 0.1
    fc2_w = jax.random.normal(ks[4], (O, H), jnp.float32) * 0.1
    fc2_b = jax.random.normal(ks[5], (O,), jnp.float32) * 0.1
    return (conv_w, conv_b, fc1_w, fc1_b, fc2_w, fc2_b)


if __name__ == "__main__":
    key = jax.random.PRNGKey(0)
    kx, kp = jax.random.split(key)
    x = jax.random.normal(kx, (B, 1, L), jnp.float32)   # PyTorch NCL: (batch, in_ch=1, length=10)
    params = init_params(kp)

    out = semaforo_forward(x, params)
    out = jax.block_until_ready(out)

    ref = reference_forward(x, params)
    assert out.shape == (B, O)
    assert jnp.allclose(out, ref, atol=1e-4, rtol=1e-4), (out, ref)
    print("KERNEL_OK")
</pallas_src>

<mosaic_0001>
module attributes {stable_mosaic.version = 11 : i64} {
  func.func @semaforo_kernel(%arg0: memref<2x10xf32, #tpu.memory_space<vmem>>, %arg1: memref<10x144xf32, #tpu.memory_space<vmem>>, %arg2: memref<1x144xf32, #tpu.memory_space<vmem>>, %arg3: memref<144x64xf32, #tpu.memory_space<vmem>>, %arg4: memref<1x64xf32, #tpu.memory_space<vmem>>, %arg5: memref<64x2xf32, #tpu.memory_space<vmem>>, %arg6: memref<1x2xf32, #tpu.memory_space<vmem>>, %arg7: memref<2x2xf32, #tpu.memory_space<vmem>>) attributes {dimension_semantics = [], scalar_prefetch = 0 : i64, scratch_operands = 0 : i64, tpu.core_type = #tpu.core_type<tc>} {
    %c0 = arith.constant 0 : index
    %c0_0 = arith.constant 0 : index
    %0 = vector.load %arg0[%c0, %c0_0] : memref<2x10xf32, #tpu.memory_space<vmem>>, vector<2x10xf32>
    %c0_1 = arith.constant 0 : index
    %c0_2 = arith.constant 0 : index
    %1 = vector.load %arg1[%c0_1, %c0_2] : memref<10x144xf32, #tpu.memory_space<vmem>>, vector<10x144xf32>
    %cst = arith.constant dense<0.000000e+00> : vector<2x144xf32>
    %2 = tpu.matmul %0, %1, %cst {dimension_numbers = #tpu.dot_dimension_numbers<[1], [0], [0], [1], [0, 0, 1, 1], [], []>} : vector<2x10xf32>, vector<10x144xf32>, vector<2x144xf32> -> vector<2x144xf32>
    %c0_3 = arith.constant 0 : index
    %c0_4 = arith.constant 0 : index
    %3 = vector.load %arg2[%c0_3, %c0_4] : memref<1x144xf32, #tpu.memory_space<vmem>>, vector<1x144xf32>
    %4 = vector.broadcast %3 : vector<1x144xf32> to vector<2x144xf32>
    %5 = arith.addf %2, %4 : vector<2x144xf32>
    %cst_5 = arith.constant 0.000000e+00 : f32
    %6 = vector.broadcast %cst_5 : f32 to vector<2x144xf32>
    %7 = arith.maximumf %5, %6 : vector<2x144xf32>
    %c0_6 = arith.constant 0 : index
    %c0_7 = arith.constant 0 : index
    %8 = vector.load %arg3[%c0_6, %c0_7] : memref<144x64xf32, #tpu.memory_space<vmem>>, vector<144x64xf32>
    %cst_8 = arith.constant dense<0.000000e+00> : vector<2x64xf32>
    %9 = tpu.matmul %7, %8, %cst_8 {dimension_numbers = #tpu.dot_dimension_numbers<[1], [0], [0], [1], [0, 0, 1, 1], [], []>} : vector<2x144xf32>, vector<144x64xf32>, vector<2x64xf32> -> vector<2x64xf32>
    %c0_9 = arith.constant 0 : index
    %c0_10 = arith.constant 0 : index
    %10 = vector.load %arg4[%c0_9, %c0_10] : memref<1x64xf32, #tpu.memory_space<vmem>>, vector<1x64xf32>
    %11 = vector.broadcast %10 : vector<1x64xf32> to vector<2x64xf32>
    %12 = arith.addf %9, %11 : vector<2x64xf32>
    %cst_11 = arith.constant 0.000000e+00 : f32
    %13 = vector.broadcast %cst_11 : f32 to vector<2x64xf32>
    %14 = arith.maximumf %12, %13 : vector<2x64xf32>
    %c0_12 = arith.constant 0 : index
    %c0_13 = arith.constant 0 : index
    %15 = vector.load %arg5[%c0_12, %c0_13] : memref<64x2xf32, #tpu.memory_space<vmem>>, vector<64x2xf32>
    %cst_14 = arith.constant dense<0.000000e+00> : vector<2x2xf32>
    %16 = tpu.matmul %14, %15, %cst_14 {dimension_numbers = #tpu.dot_dimension_numbers<[1], [0], [0], [1], [0, 0, 1, 1], [], []>} : vector<2x64xf32>, vector<64x2xf32>, vector<2x2xf32> -> vector<2x2xf32>
    %c0_15 = arith.constant 0 : index
    %c0_16 = arith.constant 0 : index
    %17 = vector.load %arg6[%c0_15, %c0_16] : memref<1x2xf32, #tpu.memory_space<vmem>>, vector<1x2xf32>
    %18 = vector.broadcast %17 : vector<1x2xf32> to vector<2x2xf32>
    %19 = arith.addf %16, %18 : vector<2x2xf32>
    %c0_17 = arith.constant 0 : index
    %c0_18 = arith.constant 0 : index
    %20 = vector.load %arg7[%c0_17, %c0_18] : memref<2x2xf32, #tpu.memory_space<vmem>>, vector<2x2xf32>
    tpu.vector_store %arg7[%c0_17, %c0_18], %19 {strides = array<i32>} : memref<2x2xf32, #tpu.memory_space<vmem>>, vector<2x2xf32>,
    return
  }
}

</mosaic_0001>

<bundles_post_ra>
// kernel: tpu_custom_call.1
= control target key start
LH: loop header
LB: loop body
LE: loop exit
PB: predicated region body
PF: predicated region fallthrough
CT: control target
= control target key end

     0   :  { %vm48_vm0 = vcmask 1041408   ;;  %v393_v5 = vmov 0.0   ;;  %vm44_vm1 = vcmask 80896   ;;  %s569_s0 = inlined_call_operand.vmem [shape: f32[2,10], index: 0, kind: input, shape index: {}]   ;;  %s570_s1 = inlined_call_operand.vmem [shape: f32[10,144], index: 1, kind: input, shape index: {}]   ;;  %s571_s2 = inlined_call_operand.vmem [shape: f32[1,144], index: 2, kind: input, shape index: {}]   ;;  %s572_s3 = inlined_call_operand.vmem [shape: f32[144,64], index: 3, kind: input, shape index: {}]   ;;  %s573_s4 = inlined_call_operand.vmem [shape: f32[1,64], index: 4, kind: input, shape index: {}]   ;;  %s574_s5 = inlined_call_operand.vmem [shape: f32[64,2], index: 5, kind: input, shape index: {}]   ;;  %s575_s6 = inlined_call_operand.vmem [shape: f32[1,2], index: 6, kind: input, shape index: {}]   ;;  %s576_s7 = inlined_call_operand.hbm [shape: f32[2,2], index: 7, kind: output, shape index: {}]  }
   0x1   :  { %v31_v0 = vld [vmem:[%s570_s1 + $0x18] sm:$0x3]  ;;  %v30_v1 = vld [vmem:[%s570_s1 + $0x10] sm:$0x3]  ;;  %v29_v2 = vld [vmem:[%s570_s1 + $0x8] sm:$0xff]  ;;  %119 = vmatprep.mubr.f32.mxu0 %v393_v5  ;;  %157 = vmatprep.subr.mxu1 %v393_v5 }
   0x2   :  { %333 = vmatprep.subr.msk.mxu0 %vm48_vm0, %v31_v0  ;;  %v28_v3 = vld [vmem:[%s570_s1] sm:$0xff]  ;;  %v143_v4 = vld [vmem:[%s572_s3 + $0x78] sm:$0xff]  ;;  %v142_v7 = vld [vmem:[%s572_s3 + $0x70] sm:$0xff] }
   0x3   :  { %334 = vmatpush1.msk.msra.mxu0 %vm48_vm0, %v30_v1  ;;  %v27_v6 = vld [vmem:[%s569_s0] sm:$0x3]  ;;  %158 = vmatpush1.msra.mxu1 %v143_v4  ;;  %v141_v8 = vld [vmem:[%s572_s3 + $0x68] sm:$0xff] }
   0x4   :  { %85 = vmatprep.subr.mxu0 %v29_v2  ;;  %159 = vmatprep.subr.mxu1 %v393_v5 }
   0x5   :  { %86 = vmatpush1.msra.mxu0 %v28_v3  ;;  %160 = vmatpush1.msra.mxu1 %v142_v7 }
   0x6   :  { %335 = vmatmul.mubr.msk.f32.vlgmr.msra.gmra.mxu0 %vm44_vm1, %v27_v6  ;;  %349 = vmatprep.subr.mxu0 %v393_v5 }
   0x7   :  { %12 = vsyncpa [#allocation3], 0  ;;  %161 = vmatprep.subr.mxu1 %v393_v5  ;;  %v140_v9 = vld [vmem:[%s572_s3 + $0x60] sm:$0xff]  ;;  %v139_v10 = vld [vmem:[%s572_s3 + $0x58] sm:$0xff]  ;;  %v34_v29 = vlaneseq  ;;  %vm153_vm2 = vcmask 130048   ;;  %vm394_vm3 = vmmov 0  }
   0x8   :  { %162 = vmatpush1.msra.mxu1 %v141_v8  ;;  %v138_v11 = vld [vmem:[%s572_s3 + $0x50] sm:$0xff]  ;;  %v137_v12 = vld [vmem:[%s572_s3 + $0x48] sm:$0xff]  ;;  %v136_v13 = vld [vmem:[%s572_s3 + $0x40] sm:$0xff]  ;;  %365 = vmatprep.mubr.msk.f32.mxu0 %vm394_vm3, %v393_v5  ;;  %vm243_vm4 = vcmask 523264   ;;  %s395_s0 = smov [#allocation2]   ;;  %vm317_vm5 = vcmask 9216  }
   0x9   :  { %163 = vmatprep.subr.mxu1 %v393_v5  ;;  %v135_v14 = vld [vmem:[%s572_s3 + $0x38] sm:$0xff]  ;;  %v134_v15 = vld [vmem:[%s572_s3 + $0x30] sm:$0xff]  ;;  %v133_v16 = vld [vmem:[%s572_s3 + $0x28] sm:$0xff]  ;;  %v35_v30 = vshrl.u32 %v34_v29, 7 }
   0xa   :  { %164 = vmatpush1.msra.mxu1 %v140_v9  ;;  %v132_v17 = vld [vmem:[%s572_s3 + $0x20] sm:$0xff]  ;;  %v131_v18 = vld [vmem:[%s572_s3 + $0x18] sm:$0xff]  ;;  %v130_v19 = vld [vmem:[%s572_s3 + $0x10] sm:$0xff] }
   0xb   :  { %165 = vmatprep.subr.mxu1 %v393_v5  ;;  %v129_v20 = vld [vmem:[%s572_s3 + $0x8] sm:$0xff]  ;;  %v128_v21 = vld [vmem:[%s572_s3] sm:$0xff]  ;;  %v235_v24 = vld [vmem:[%s574_s5 + $0x38] sm:$0xff]  ;;  %v36_v31 = vsub.s32 0, %v35_v30  ;;  %v40_v33 = vsub.s32 1, %v35_v30 }
   0xc   :  { %166 = vmatpush1.msra.mxu1 %v139_v10  ;;  %v145_v22 = vld [vmem:[%s572_s3 + $0x88] sm:$0xff]  ;;  %v144_v23 = vld [vmem:[%s572_s3 + $0x80] sm:$0xff]  ;;  %v234_v25 = vld [vmem:[%s574_s5 + $0x30] sm:$0xff]  ;;  %350 = vmatpush3.msra.mxu0 %v235_v24 }
   0xd   :  { %167 = vmatprep.subr.mxu1 %v393_v5  ;;  %351 = vmatprep.subr.mxu0 %v393_v5  ;;  %v233_v26 = vld [vmem:[%s574_s5 + $0x28] sm:$0xff]  ;;  %v232_v27 = vld [vmem:[%s574_s5 + $0x20] sm:$0xff]  ;;  %v231_v28 = vld [vmem:[%s574_s5 + $0x18] sm:$0xff] }
   0xe   :  { %168 = vmatpush1.msra.mxu1 %v138_v11  ;;  %352 = vmatpush3.msra.mxu0 %v234_v25  ;;  %v32_v32 = vld [vmem:[%s571_s2] sm:$0x3]  ;;  %v230_v42 = vld [vmem:[%s574_s5 + $0x10] sm:$0xff]  ;;  %v229_v43 = vld [vmem:[%s574_s5 + $0x8] sm:$0xff] }
   0xf   :  { %169 = vmatprep.subr.mxu1 %v393_v5  ;;  %353 = vmatprep.subr.mxu0 %v393_v5  ;;  %v37_v34 = vrot.slane %v32_v32, %v36_v31  ;;  %v41_v35 = vrot.slane %v32_v32, %v40_v33  ;;  %v228_v44 = vld [vmem:[%s574_s5] sm:$0xff]  ;;  %s325_s5 = sshll.u32 %s395_s0, 4  ;;  %s326_s5 = int_to_ptr.vmem [resolvable:$true] %s325_s5 }
  0x10   :  { %170 = vmatpush1.msra.mxu1 %v137_v12  ;;  %354 = vmatpush3.msra.mxu0 %v233_v26  ;;  %v336_v45 = vld [vmem:[%s573_s4] ss:$0 sm:$0xff]  ;;  %s371_s16 = scalar_lea.vmem %s326_s5, 32  ;;  %p376_p1 = scmp.lt.s32.totalorder %s326_s5, %s326_s5 }
  0x11   :  { %171 = vmatprep.subr.mxu1 %v393_v5  ;;  %355 = vmatprep.subr.mxu0 %v393_v5  ;;  %v338_v50 = vld [vmem:[%s575_s6] ss:$0 sm:$0xff]  ;;  %p372_p0 = scmp.ne.s32.totalorder %s326_s5, %s371_s16  ;;  %p377_p2 = scmp.lt.s32.totalorder %s371_s16, %s371_s16 }
  0x12   :  { %172 = vmatpush1.msra.mxu1 %v136_v13  ;;  %356 = vmatpush3.msra.mxu0 %v232_v27 }
  0x13   :  { %173 = vmatprep.subr.mxu1 %v393_v5  ;;  %357 = vmatprep.subr.mxu0 %v393_v5  ;;  %p378_p3 = por %p377_p2, %p376_p1 }
  0x14   :  { %174 = vmatpush1.msra.mxu1 %v135_v14  ;;  %358 = vmatpush3.msra.mxu0 %v231_v28 }
  0x15   :  { %175 = vmatprep.subr.mxu1 %v393_v5  ;;  %359 = vmatprep.subr.mxu0 %v393_v5  ;;  %p379_p4 = pnand %p378_p3, %p372_p0 }
  0x16   :  { %176 = vmatpush1.msra.mxu1 %v134_v15  ;;  %360 = vmatpush3.msra.mxu0 %v230_v42 }
  0x17   :  { %177 = vmatprep.subr.mxu1 %v393_v5  ;;  %361 = vmatprep.subr.mxu0 %v393_v5 }
  0x18   :  { %178 = vmatpush1.msra.mxu1 %v133_v16  ;;  %362 = vmatpush3.msra.mxu0 %v229_v43 }
  0x19   :  { %179 = vmatprep.subr.mxu1 %v393_v5  ;;  %363 = vmatprep.subr.mxu0 %v393_v5 }
  0x1a   :  { %180 = vmatpush1.msra.mxu1 %v132_v17  ;;  %364 = vmatpush3.msra.mxu0 %v228_v44 }
  0x1b   :  { %181 = vmatprep.subr.mxu1 %v393_v5 }
  0x1c   :  { %182 = vmatpush1.msra.mxu1 %v131_v18 }
  0x1d   :  { %183 = vmatprep.subr.mxu1 %v393_v5 }
  0x1e   :  { %184 = vmatpush1.msra.mxu1 %v130_v19 }
  0x1f   :  { %185 = vmatprep.subr.mxu1 %v393_v5 }
  0x20   :  { %186 = vmatpush1.msra.mxu1 %v129_v20 }
  0x21   :  { %187 = vmatprep.subr.mxu1 %v393_v5 }
  0x22   :  { %188 = vmatpush1.msra.mxu1 %v128_v21 }
  0x23   :  { %217 = vmatprep.subr.mxu1 %v393_v5 }
  0x24   :  { %218 = vmatpush2.msra.mxu1 %v145_v22 }
  0x25   :  { %219 = vmatprep.subr.mxu1 %v393_v5 }
  0x26   :  { %220 = vmatpush2.msra.mxu1 %v144_v23 }
  0xc6   :  { %v121_v36 = vpop.f32.mrf.mxu0 }
  0xc7   :  { %v122_v37 = vadd.f32 %v121_v36, %v37_v34 }
  0xc8   :  { %v123_v38 = vpop.f32.mrf.mxu0 }
  0xc9   :  { %v124_v39 = vadd.f32 %v123_v38, %v41_v35  ;;  %v126_v41 = vmax.f32 %v122_v37, 0.0 }
  0xcb   :  { %v127_v40 = vmax.f32 %v124_v39, 0.0 }
  0xcd   :  { %337 = vmatprep.mubr.msk.f32.mxu1 %vm153_vm2, %v127_v40 }
  0xce   :  { %222 = vmatmul.mubr.f32.vlgmr.msra.gmra.mxu1 %v126_v41 }
 0x18e   :  { %v223_v46 = vpop.f32.mrf.mxu1 }
 0x18f   :  { %v224_v47 = vadd.f32 %v336_v45, %v223_v46 }
 0x190   :  { %v225_v48 = vpop.f32.mrf.mxu1 }
 0x191   :  { %v227_v49 = vmax.f32 %v224_v47, 0.0 }
 0x193   :  { %366 = vmatmul.mubr.msk.f32.vlgmr.msra.gmra.mxu0 %vm243_vm4, %v227_v49 }
 0x253   :  { %v313_v51 = vpop.f32.mrf.mxu0 }
 0x254   :  { %v314_v52 = vadd.f32 %v338_v50, %v313_v51 }
 0x255   :  { %v367_v53 = vpop.f32.mrf.mxu0 }
 0x256   :  { %318 = vst.msk [vmem:[#allocation2] sm:$0x3] %vm317_vm5, %v314_v52 }
 0x257   :  { %382 = shalt.err (!%p379_p4)
}
 0x258   :  { %328 = dma.vmem_to_hbm [thread:$0]  %s326_s5, 32, %s576_s7, [#allocation3]  }
 0x259   :  { %391 = dma.done.wait [#allocation3], 32  }
 0x25a   :  { %392 = vsyncadd [#allocation3], 4294967264 }
 0x25b   :  { %332 = vsyncpa [#allocation3], 1 }

</bundles_post_ra>
